<compile_context>
chip_gen: v7x
topology: tpu7x:2x2x1
jax: 0.10.0
libtpu: 0.0.40
codegen_flags: <defaults>
</compile_context>

<pallas_src>
import functools
import math

import jax
import jax.numpy as jnp
from jax import lax
from jax.experimental import pallas as pl
from jax.experimental.pallas import tpu as pltpu


# ----------------------------------------------------------------------------
# Fused kernel.  One grid step = (one batch element, one query tile).
#   q_ref              : (TQ, d_model) f32   query tile
#   k_ref / v_ref      : (S,  d_model) f32   full key/value rows for this batch
#   w*_ref             : (d_model, d_model) bf16 (transposed, scale folded in wq)
#   b*_ref             : (1, d_model) f32
#   o_ref              : (TQ, d_model) f32   lane-dense output slab
#   q_scr / attn_scr   : (TQ, d_model) bf16  VMEM scratch
#   k_scr / v_scr      : (S,  d_model) bf16  VMEM scratch
# ----------------------------------------------------------------------------
def _msa_fused_kernel(q_ref, k_ref, v_ref,
                      wq_ref, bq_ref, wk_ref, bk_ref, wv_ref, bv_ref,
                      wo_ref, bo_ref,
                      o_ref,
                      q_scr, k_scr, v_scr, attn_scr,
                      *, h, d_k):
    bf16 = jnp.bfloat16
    f32 = jnp.float32

    # --- QKV projections: cast to bf16 once right after the bias add --------
    # (1/sqrt(d_k) is already folded into wq_ref / bq_ref at prep time.)
    # TODO(synk): if used as self-attention (query is key is value), fuse
    #             Wq|Wk|Wv into one (d_model, 3*d_model) weight / single matmul.
    q_scr[...] = (jnp.dot(q_ref[...].astype(bf16), wq_ref[...],
                          preferred_element_type=f32) + bq_ref[...]).astype(bf16)
    k_scr[...] = (jnp.dot(k_ref[...].astype(bf16), wk_ref[...],
                          preferred_element_type=f32) + bk_ref[...]).astype(bf16)
    v_scr[...] = (jnp.dot(v_ref[...].astype(bf16), wv_ref[...],
                          preferred_element_type=f32) + bv_ref[...]).astype(bf16)

    # --- per-head attention ---------------------------------------------------
    # Each head's (TQ, d_k) result is written straight into the lane-dense attn
    # scratch, so its intermediates (scores/probs) die immediately; no list +
    # concatenate keeping h f32 blocks live.  Static offsets -> aligned slices.
    for head in range(h):
        sl = slice(head * d_k, (head + 1) * d_k)
        qh = q_scr[:, sl]                                       # (TQ, d_k) bf16
        kh = k_scr[:, sl]                                       # (S,  d_k) bf16
        vh = v_scr[:, sl]                                       # (S,  d_k) bf16

        # scores = qh @ kh^T via trans-B contraction (no materialized k.T).
        # Q-tiling bounds this block to (TQ, S) rather than (S, S).
        s = lax.dot_general(qh, kh, (((1,), (1,)), ((), ())),
                            preferred_element_type=f32)         # (TQ, S) f32
        # TODO(synk): optional `mask` argument (masked_fill with -1e9) not wired.
        s = s - jnp.max(s, axis=-1, keepdims=True)
        p = jnp.exp(s)
        p = p * pl.reciprocal(jnp.sum(p, axis=-1, keepdims=True), approx=True)
        # TODO(synk): training-mode dropout on p is treated as identity (eval).
        attn_scr[:, sl] = jnp.dot(p.astype(bf16), vh,
                                  preferred_element_type=f32).astype(bf16)
        # TODO(synk): for very long S on v7x (64 MiB VMEM), add flash-style
        #             online-softmax KV chunking so scores are bounded by a
        #             (TQ, TK) tile instead of (TQ, S).

    # --- output projection from the lane-dense scratch slab -----------------
    out = jnp.dot(attn_scr[...], wo_ref[...],
                  preferred_element_type=f32) + bo_ref[...]
    o_ref[...] = out.astype(o_ref.dtype)


def _choose_q_tile(S):
    """Largest q-tile <= 512 that divides S and keeps the (8,128) rule happy."""
    if S <= 512:
        return S
    for tq in (512, 256, 128, 64, 32, 16, 8):
        if S % tq == 0:
            return tq
    return S


def msa_attention2_forward(prepped, query, key, value, *, q_tile=None):
    """query/key/value: (B, S, d_model) f32 -> (B, S, d_model) f32."""
    h, d_k = prepped["h"], prepped["d_k"]
    B, S, d_model = query.shape

    TQ = q_tile if q_tile is not None else _choose_q_tile(S)
    assert S % TQ == 0 and (TQ == S or TQ % 8 == 0)
    nq = S // TQ

    # Query / output tiles walk the q-tile axis; key / value blocks are the full
    # (S, d_model) rows of this batch element with a constant index across the
    # q-tile axis, so they stay VMEM-resident (no re-DMA) across q-tiles.
    q_spec = pl.BlockSpec((None, TQ, d_model), lambda b, qi: (b, qi, 0))
    kv_spec = pl.BlockSpec((None, S, d_model), lambda b, qi: (b, 0, 0))
    o_spec = pl.BlockSpec((None, TQ, d_model), lambda b, qi: (b, qi, 0))
    # Weights / biases are grid-invariant -> single-buffered (double-buffering a
    # constant-index block is pure VMEM waste).
    w_spec = pl.BlockSpec((d_model, d_model), lambda b, qi: (0, 0),
                          pipeline_mode=pl.Buffered(1))
    b_spec = pl.BlockSpec((1, d_model), lambda b, qi: (0, 0),
                          pipeline_mode=pl.Buffered(1))

    # VMEM budget for this tiling (+ headroom) so the default 16/32 MiB scoped
    # limit on v5e / v6e / v7x does not cap the kernel.
    f32b, bf16b = 4, 2
    vmem_bytes = (
        2 * TQ * d_model * f32b            # q block (double-buffered)
        + 2 * 2 * S * d_model * f32b       # k, v blocks (double-buffered)
        + 2 * TQ * d_model * f32b          # output block (double-buffered)
        + 4 * d_model * d_model * bf16b    # weights (single-buffered)
        + 4 * d_model * f32b               # biases
        + 2 * TQ * d_model * bf16b         # q_scr + attn_scr
        + 2 * S * d_model * bf16b          # k_scr + v_scr
        + 3 * TQ * S * f32b                # per-head scores / probs transients
        + (TQ + 2 * S) * d_model * f32b    # f32 projection results pre-store
    )
    vmem_limit = int(min(128 * 1024 * 1024,
                         max(32 * 1024 * 1024, int(vmem_bytes * 1.5))))

    cost = pl.CostEstimate(
        flops=int(2 * B * (4 * S * d_model * d_model + 2 * h * S * S * d_k)),
        transcendentals=int(B * h * S * S),
        bytes_accessed=int(4 * B * S * d_model * f32b
                           + 4 * d_model * d_model * bf16b
                           + 4 * d_model * f32b),
    )

    kernel = functools.partial(_msa_fused_kernel, h=h, d_k=d_k)

    return pl.pallas_call(
        kernel,
        out_shape=jax.ShapeDtypeStruct((B, S, d_model), query.dtype),
        grid=(B, nq),
        in_specs=[q_spec, kv_spec, kv_spec,
                  w_spec, b_spec,    # wq, bq (scale folded)
                  w_spec, b_spec,    # wk, bk
                  w_spec, b_spec,    # wv, bv
                  w_spec, b_spec],   # wo, bo
        out_specs=o_spec,
        scratch_shapes=[pltpu.VMEM((TQ, d_model), jnp.bfloat16),   # q_scr
                        pltpu.VMEM((S, d_model), jnp.bfloat16),    # k_scr
                        pltpu.VMEM((S, d_model), jnp.bfloat16),    # v_scr
                        pltpu.VMEM((TQ, d_model), jnp.bfloat16)],  # attn_scr
        compiler_params=pltpu.CompilerParams(
            dimension_semantics=("parallel", "parallel"),
            vmem_limit_bytes=vmem_limit),
        cost_estimate=cost,
    )(query, key, value,
      prepped["wq_t"], prepped["bq"],
      prepped["wk_t"], prepped["bk"],
      prepped["wv_t"], prepped["bv"],
      prepped["wo_t"], prepped["bo"])


# ----------------------------------------------------------------------------
# One-time parameter prep (hoisted out of the forward): transpose weights to
# (in, out), fold 1/sqrt(d_k) into Wq/bq, cast matmul operands to bf16.
# ----------------------------------------------------------------------------
def prepare_params(params, matmul_dtype=jnp.bfloat16):
    h = params["h"]
    d_model = params["wq"].shape[0]
    d_k = d_model // h
    scale = 1.0 / math.sqrt(d_k)

    def wt(w, s=1.0):
        return (w.T * s).astype(matmul_dtype)          # torch Linear: y = x @ W.T + b

    def bias(b, s=1.0):
        return (b * s).reshape(1, d_model).astype(jnp.float32)

    return {
        "h": h, "d_k": d_k,
        "wq_t": wt(params["wq"], scale), "bq": bias(params["bq"], scale),
        "wk_t": wt(params["wk"]),        "bk": bias(params["bk"]),
        "wv_t": wt(params["wv"]),        "bv": bias(params["bv"]),
        "wo_t": wt(params["wo"]),        "bo": bias(params["bo"]),
    }


# ----------------------------------------------------------------------------
# Pure-JAX f32 reference (semantics of the PyTorch module, eval / mask=None)
# ----------------------------------------------------------------------------
def reference_forward(params, query, key, value):
    h = params["h"]
    B, S, d_model = query.shape
    d_k = d_model // h

    def project(x, w, b):
        y = x @ w.T + b
        return y.reshape(B, S, h, d_k).transpose(0, 2, 1, 3)

    q = project(query, params["wq"], params["bq"])
    k = project(key,   params["wk"], params["bk"])
    v = project(value, params["wv"], params["bv"])

    scores = jnp.einsum("bhqd,bhkd->bhqk", q, k) / math.sqrt(d_k)
    p = jax.nn.softmax(scores, axis=-1)
    x = jnp.einsum("bhqk,bhkd->bhqd", p, v)
    x = x.transpose(0, 2, 1, 3).reshape(B, S, d_model)
    return x @ params["wo"].T + params["bo"]


def init_params(key, h, d_model):
    keys = jax.random.split(key, 8)
    bound = 1.0 / math.sqrt(d_model)

    def w(k):
        return jax.random.uniform(k, (d_model, d_model), jnp.float32, -bound, bound)

    def b(k):
        return jax.random.uniform(k, (d_model,), jnp.float32, -bound, bound)

    return {
        "h": h,
        "wq": w(keys[0]), "bq": b(keys[1]),
        "wk": w(keys[2]), "bk": b(keys[3]),
        "wv": w(keys[4]), "bv": b(keys[5]),
        "wo": w(keys[6]), "bo": b(keys[7]),
    }


if __name__ == "__main__":
    h, d_model = 4, 32
    root = jax.random.PRNGKey(0)
    kp, kq, kk, kv, kq2, kk2, kv2 = jax.random.split(root, 7)
    params = init_params(kp, h, d_model)
    prepped = prepare_params(params)

    # Check 1: single q-tile (TQ == S) path.
    B, S = 2, 8
    query = jax.random.normal(kq, (B, S, d_model), jnp.float32)
    key_in = jax.random.normal(kk, (B, S, d_model), jnp.float32)
    value = jax.random.normal(kv, (B, S, d_model), jnp.float32)

    out = jax.block_until_ready(msa_attention2_forward(prepped, query, key_in, value))
    ref = reference_forward(params, query, key_in, value)
    assert out.shape == (B, S, d_model)
    # bf16 MXU operands + EUP approx reciprocal vs. pure-f32 reference.
    assert jnp.allclose(out, ref, atol=5e-2, rtol=5e-2), "mismatch vs reference (TQ=S)"

    # Check 2: exercise the q-tiled grid path (nq = 2) at small shapes.
    B2, S2, TQ2 = 2, 16, 8
    query2 = jax.random.normal(kq2, (B2, S2, d_model), jnp.float32)
    key2 = jax.random.normal(kk2, (B2, S2, d_model), jnp.float32)
    value2 = jax.random.normal(kv2, (B2, S2, d_model), jnp.float32)

    out2 = jax.block_until_ready(
        msa_attention2_forward(prepped, query2, key2, value2, q_tile=TQ2))
    ref2 = reference_forward(params, query2, key2, value2)
    assert out2.shape == (B2, S2, d_model)
    assert jnp.allclose(out2, ref2, atol=5e-2, rtol=5e-2), "mismatch vs reference (tiled)"

    print("KERNEL_OK")
</pallas_src>

<mosaic_0001>
module attributes {stable_mosaic.version = 11 : i64} {
  func.func @_msa_fused_kernel(%arg0: i32, %arg1: i32, %arg2: memref<1x8x32xf32, #tpu.memory_space<vmem>>, %arg3: memref<1x8x32xf32, #tpu.memory_space<vmem>>, %arg4: memref<1x8x32xf32, #tpu.memory_space<vmem>>, %arg5: memref<32x32xbf16, #tpu.memory_space<vmem>>, %arg6: memref<1x32xf32, #tpu.memory_space<vmem>>, %arg7: memref<32x32xbf16, #tpu.memory_space<vmem>>, %arg8: memref<1x32xf32, #tpu.memory_space<vmem>>, %arg9: memref<32x32xbf16, #tpu.memory_space<vmem>>, %arg10: memref<1x32xf32, #tpu.memory_space<vmem>>, %arg11: memref<32x32xbf16, #tpu.memory_space<vmem>>, %arg12: memref<1x32xf32, #tpu.memory_space<vmem>>, %arg13: memref<1x8x32xf32, #tpu.memory_space<vmem>>, %arg14: memref<8x32xbf16, #tpu.memory_space<vmem>>, %arg15: memref<8x32xbf16, #tpu.memory_space<vmem>>, %arg16: memref<8x32xbf16, #tpu.memory_space<vmem>>, %arg17: memref<8x32xbf16, #tpu.memory_space<vmem>>) attributes {dimension_semantics = [#tpu.dimension_semantics<parallel>, #tpu.dimension_semantics<parallel>], iteration_bounds = array<i64: 2, 1>, scalar_prefetch = 0 : i64, scratch_operands = 4 : i64, tpu.core_type = #tpu.core_type<tc>, window_params = [{transform_indices = @transform_0, window_bounds = array<i64: 1, 8, 32>}, {transform_indices = @transform_1, window_bounds = array<i64: 1, 8, 32>}, {transform_indices = @transform_2, window_bounds = array<i64: 1, 8, 32>}, {pipeline_mode = #tpu.pipeline_mode<synchronous>, transform_indices = @transform_3, window_bounds = array<i64: 32, 32>}, {pipeline_mode = #tpu.pipeline_mode<synchronous>, transform_indices = @transform_4, window_bounds = array<i64: 1, 32>}, {pipeline_mode = #tpu.pipeline_mode<synchronous>, transform_indices = @transform_5, window_bounds = array<i64: 32, 32>}, {pipeline_mode = #tpu.pipeline_mode<synchronous>, transform_indices = @transform_6, window_bounds = array<i64: 1, 32>}, {pipeline_mode = #tpu.pipeline_mode<synchronous>, transform_indices = @transform_7, window_bounds = array<i64: 32, 32>}, {pipeline_mode = #tpu.pipeline_mode<synchronous>, transform_indices = @transform_8, window_bounds = array<i64: 1, 32>}, {pipeline_mode = #tpu.pipeline_mode<synchronous>, transform_indices = @transform_9, window_bounds = array<i64: 32, 32>}, {pipeline_mode = #tpu.pipeline_mode<synchronous>, transform_indices = @transform_10, window_bounds = array<i64: 1, 32>}, {transform_indices = @transform_11, window_bounds = array<i64: 1, 8, 32>}]} {
    %c0 = arith.constant 0 : index
    %c0_0 = arith.constant 0 : index
    %c0_1 = arith.constant 0 : index
    %0 = vector.load %arg2[%c0, %c0_0, %c0_1] : memref<1x8x32xf32, #tpu.memory_space<vmem>>, vector<1x8x32xf32>
    %1 = vector.shape_cast %0 : vector<1x8x32xf32> to vector<8x32xf32>
    %2 = arith.truncf %1 : vector<8x32xf32> to vector<8x32xbf16>
    %c0_2 = arith.constant 0 : index
    %c0_3 = arith.constant 0 : index
    %3 = vector.load %arg5[%c0_2, %c0_3] : memref<32x32xbf16, #tpu.memory_space<vmem>>, vector<32x32xbf16>
    %cst = arith.constant dense<0.000000e+00> : vector<8x32xf32>
    %4 = tpu.matmul %2, %3, %cst {dimension_numbers = #tpu.dot_dimension_numbers<[1], [0], [0], [1], [0, 0, 1, 1], [], []>} : vector<8x32xbf16>, vector<32x32xbf16>, vector<8x32xf32> -> vector<8x32xf32>
    %c0_4 = arith.constant 0 : index
    %c0_5 = arith.constant 0 : index
    %5 = vector.load %arg6[%c0_4, %c0_5] : memref<1x32xf32, #tpu.memory_space<vmem>>, vector<1x32xf32>
    %6 = vector.broadcast %5 : vector<1x32xf32> to vector<8x32xf32>
    %7 = arith.addf %4, %6 : vector<8x32xf32>
    %8 = arith.truncf %7 : vector<8x32xf32> to vector<8x32xbf16>
    %c0_6 = arith.constant 0 : index
    %c0_7 = arith.constant 0 : index
    %9 = vector.load %arg14[%c0_6, %c0_7] : memref<8x32xbf16, #tpu.memory_space<vmem>>, vector<8x32xbf16>
    tpu.vector_store %arg14[%c0_6, %c0_7], %8 {strides = array<i32>} : memref<8x32xbf16, #tpu.memory_space<vmem>>, vector<8x32xbf16>,
    %c0_8 = arith.constant 0 : index
    %c0_9 = arith.constant 0 : index
    %c0_10 = arith.constant 0 : index
    %10 = vector.load %arg3[%c0_8, %c0_9, %c0_10] : memref<1x8x32xf32, #tpu.memory_space<vmem>>, vector<1x8x32xf32>
    %11 = vector.shape_cast %10 : vector<1x8x32xf32> to vector<8x32xf32>
    %12 = arith.truncf %11 : vector<8x32xf32> to vector<8x32xbf16>
    %c0_11 = arith.constant 0 : index
    %c0_12 = arith.constant 0 : index
    %13 = vector.load %arg7[%c0_11, %c0_12] : memref<32x32xbf16, #tpu.memory_space<vmem>>, vector<32x32xbf16>
    %cst_13 = arith.constant dense<0.000000e+00> : vector<8x32xf32>
    %14 = tpu.matmul %12, %13, %cst_13 {dimension_numbers = #tpu.dot_dimension_numbers<[1], [0], [0], [1], [0, 0, 1, 1], [], []>} : vector<8x32xbf16>, vector<32x32xbf16>, vector<8x32xf32> -> vector<8x32xf32>
    %c0_14 = arith.constant 0 : index
    %c0_15 = arith.constant 0 : index
    %15 = vector.load %arg8[%c0_14, %c0_15] : memref<1x32xf32, #tpu.memory_space<vmem>>, vector<1x32xf32>
    %16 = vector.broadcast %15 : vector<1x32xf32> to vector<8x32xf32>
    %17 = arith.addf %14, %16 : vector<8x32xf32>
    %18 = arith.truncf %17 : vector<8x32xf32> to vector<8x32xbf16>
    %c0_16 = arith.constant 0 : index
    %c0_17 = arith.constant 0 : index
    %19 = vector.load %arg15[%c0_16, %c0_17] : memref<8x32xbf16, #tpu.memory_space<vmem>>, vector<8x32xbf16>
    tpu.vector_store %arg15[%c0_16, %c0_17], %18 {strides = array<i32>} : memref<8x32xbf16, #tpu.memory_space<vmem>>, vector<8x32xbf16>,
    %c0_18 = arith.constant 0 : index
    %c0_19 = arith.constant 0 : index
    %c0_20 = arith.constant 0 : index
    %20 = vector.load %arg4[%c0_18, %c0_19, %c0_20] : memref<1x8x32xf32, #tpu.memory_space<vmem>>, vector<1x8x32xf32>
    %21 = vector.shape_cast %20 : vector<1x8x32xf32> to vector<8x32xf32>
    %22 = arith.truncf %21 : vector<8x32xf32> to vector<8x32xbf16>
    %c0_21 = arith.constant 0 : index
    %c0_22 = arith.constant 0 : index
    %23 = vector.load %arg9[%c0_21, %c0_22] : memref<32x32xbf16, #tpu.memory_space<vmem>>, vector<32x32xbf16>
    %cst_23 = arith.constant dense<0.000000e+00> : vector<8x32xf32>
    %24 = tpu.matmul %22, %23, %cst_23 {dimension_numbers = #tpu.dot_dimension_numbers<[1], [0], [0], [1], [0, 0, 1, 1], [], []>} : vector<8x32xbf16>, vector<32x32xbf16>, vector<8x32xf32> -> vector<8x32xf32>
    %c0_24 = arith.constant 0 : index
    %c0_25 = arith.constant 0 : index
    %25 = vector.load %arg10[%c0_24, %c0_25] : memref<1x32xf32, #tpu.memory_space<vmem>>, vector<1x32xf32>
    %26 = vector.broadcast %25 : vector<1x32xf32> to vector<8x32xf32>
    %27 = arith.addf %24, %26 : vector<8x32xf32>
    %28 = arith.truncf %27 : vector<8x32xf32> to vector<8x32xbf16>
    %c0_26 = arith.constant 0 : index
    %c0_27 = arith.constant 0 : index
    %29 = vector.load %arg16[%c0_26, %c0_27] : memref<8x32xbf16, #tpu.memory_space<vmem>>, vector<8x32xbf16>
    tpu.vector_store %arg16[%c0_26, %c0_27], %28 {strides = array<i32>} : memref<8x32xbf16, #tpu.memory_space<vmem>>, vector<8x32xbf16>,
    %c0_28 = arith.constant 0 : index
    %c0_29 = arith.constant 0 : index
    %30 = vector.load %arg14[%c0_28, %c0_29] : memref<8x32xbf16, #tpu.memory_space<vmem>>, vector<8x8xbf16>
    %c0_30 = arith.constant 0 : index
    %c0_31 = arith.constant 0 : index
    %31 = vector.load %arg15[%c0_30, %c0_31] : memref<8x32xbf16, #tpu.memory_space<vmem>>, vector<8x8xbf16>
    %c0_32 = arith.constant 0 : index
    %c0_33 = arith.constant 0 : index
    %32 = vector.load %arg16[%c0_32, %c0_33] : memref<8x32xbf16, #tpu.memory_space<vmem>>, vector<8x8xbf16>
    %cst_34 = arith.constant dense<0.000000e+00> : vector<8x8xf32>
    %33 = tpu.matmul %30, %31, %cst_34 {dimension_numbers = #tpu.dot_dimension_numbers<[1], [1], [0], [0], [0, 0, 1, 0], [], []>} : vector<8x8xbf16>, vector<8x8xbf16>, vector<8x8xf32> -> vector<8x8xf32>
    %cst_35 = arith.constant dense<0xFF800000> : vector<8xf32>
    %34 = vector.multi_reduction <maximumf>, %33, %cst_35 [1] : vector<8x8xf32> to vector<8xf32>
    %35 = vector.shape_cast %34 : vector<8xf32> to vector<8x1xf32>
    %36 = vector.broadcast %35 : vector<8x1xf32> to vector<8x8xf32>
    %37 = arith.subf %33, %36 : vector<8x8xf32>
    %38 = math.exp %37 : vector<8x8xf32>
    %cst_36 = arith.constant dense<0.000000e+00> : vector<8xf32>
    %39 = vector.multi_reduction <add>, %38, %cst_36 [1] : vector<8x8xf32> to vector<8xf32>
    %40 = vector.shape_cast %39 : vector<8xf32> to vector<8x1xf32>
    %41 = tpu.reciprocal %40 {approx = true} : vector<8x1xf32> -> vector<8x1xf32>
    %42 = vector.broadcast %41 : vector<8x1xf32> to vector<8x8xf32>
    %43 = arith.mulf %38, %42 : vector<8x8xf32>
    %44 = arith.truncf %43 : vector<8x8xf32> to vector<8x8xbf16>
    %cst_37 = arith.constant dense<0.000000e+00> : vector<8x8xf32>
    %45 = tpu.matmul %44, %32, %cst_37 {dimension_numbers = #tpu.dot_dimension_numbers<[1], [0], [0], [1], [0, 0, 1, 1], [], []>} : vector<8x8xbf16>, vector<8x8xbf16>, vector<8x8xf32> -> vector<8x8xf32>
    %46 = arith.truncf %45 : vector<8x8xf32> to vector<8x8xbf16>
    %c0_38 = arith.constant 0 : index
    %c0_39 = arith.constant 0 : index
    %47 = vector.load %arg17[%c0_38, %c0_39] : memref<8x32xbf16, #tpu.memory_space<vmem>>, vector<8x8xbf16>
    tpu.vector_store %arg17[%c0_38, %c0_39], %46 {strides = array<i32>} : memref<8x32xbf16, #tpu.memory_space<vmem>>, vector<8x8xbf16>,
    %c0_40 = arith.constant 0 : index
    %c8 = arith.constant 8 : index
    %48 = vector.load %arg14[%c0_40, %c8] : memref<8x32xbf16, #tpu.memory_space<vmem>>, vector<8x8xbf16>
    %c0_41 = arith.constant 0 : index
    %c8_42 = arith.constant 8 : index
    %49 = vector.load %arg15[%c0_41, %c8_42] : memref<8x32xbf16, #tpu.memory_space<vmem>>, vector<8x8xbf16>
    %c0_43 = arith.constant 0 : index
    %c8_44 = arith.constant 8 : index
    %50 = vector.load %arg16[%c0_43, %c8_44] : memref<8x32xbf16, #tpu.memory_space<vmem>>, vector<8x8xbf16>
    %cst_45 = arith.constant dense<0.000000e+00> : vector<8x8xf32>
    %51 = tpu.matmul %48, %49, %cst_45 {dimension_numbers = #tpu.dot_dimension_numbers<[1], [1], [0], [0], [0, 0, 1, 0], [], []>} : vector<8x8xbf16>, vector<8x8xbf16>, vector<8x8xf32> -> vector<8x8xf32>
    %cst_46 = arith.constant dense<0xFF800000> : vector<8xf32>
    %52 = vector.multi_reduction <maximumf>, %51, %cst_46 [1] : vector<8x8xf32> to vector<8xf32>
    %53 = vector.shape_cast %52 : vector<8xf32> to vector<8x1xf32>
    %54 = vector.broadcast %53 : vector<8x1xf32> to vector<8x8xf32>
    %55 = arith.subf %51, %54 : vector<8x8xf32>
    %56 = math.exp %55 : vector<8x8xf32>
    %cst_47 = arith.constant dense<0.000000e+00> : vector<8xf32>
    %57 = vector.multi_reduction <add>, %56, %cst_47 [1] : vector<8x8xf32> to vector<8xf32>
    %58 = vector.shape_cast %57 : vector<8xf32> to vector<8x1xf32>
    %59 = tpu.reciprocal %58 {approx = true} : vector<8x1xf32> -> vector<8x1xf32>
    %60 = vector.broadcast %59 : vector<8x1xf32> to vector<8x8xf32>
    %61 = arith.mulf %56, %60 : vector<8x8xf32>
    %62 = arith.truncf %61 : vector<8x8xf32> to vector<8x8xbf16>
    %cst_48 = arith.constant dense<0.000000e+00> : vector<8x8xf32>
    %63 = tpu.matmul %62, %50, %cst_48 {dimension_numbers = #tpu.dot_dimension_numbers<[1], [0], [0], [1], [0, 0, 1, 1], [], []>} : vector<8x8xbf16>, vector<8x8xbf16>, vector<8x8xf32> -> vector<8x8xf32>
    %64 = arith.truncf %63 : vector<8x8xf32> to vector<8x8xbf16>
    %c0_49 = arith.constant 0 : index
    %c8_50 = arith.constant 8 : index
    %65 = vector.load %arg17[%c0_49, %c8_50] : memref<8x32xbf16, #tpu.memory_space<vmem>>, vector<8x8xbf16>
    tpu.vector_store %arg17[%c0_49, %c8_50], %64 {strides = array<i32>} : memref<8x32xbf16, #tpu.memory_space<vmem>>, vector<8x8xbf16>,
    %c0_51 = arith.constant 0 : index
    %c16 = arith.constant 16 : index
    %66 = vector.load %arg14[%c0_51, %c16] : memref<8x32xbf16, #tpu.memory_space<vmem>>, vector<8x8xbf16>
    %c0_52 = arith.constant 0 : index
    %c16_53 = arith.constant 16 : index
    %67 = vector.load %arg15[%c0_52, %c16_53] : memref<8x32xbf16, #tpu.memory_space<vmem>>, vector<8x8xbf16>
    %c0_54 = arith.constant 0 : index
    %c16_55 = arith.constant 16 : index
    %68 = vector.load %arg16[%c0_54, %c16_55] : memref<8x32xbf16, #tpu.memory_space<vmem>>, vector<8x8xbf16>
    %cst_56 = arith.constant dense<0.000000e+00> : vector<8x8xf32>
    %69 = tpu.matmul %66, %67, %cst_56 {dimension_numbers = #tpu.dot_dimension_numbers<[1], [1], [0], [0], [0, 0, 1, 0], [], []>} : vector<8x8xbf16>, vector<8x8xbf16>, vector<8x8xf32> -> vector<8x8xf32>
    %cst_57 = arith.constant dense<0xFF800000> : vector<8xf32>
    %70 = vector.multi_reduction <maximumf>, %69, %cst_57 [1] : vector<8x8xf32> to vector<8xf32>
    %71 = vector.shape_cast %70 : vector<8xf32> to vector<8x1xf32>
    %72 = vector.broadcast %71 : vector<8x1xf32> to vector<8x8xf32>
    %73 = arith.subf %69, %72 : vector<8x8xf32>
    %74 = math.exp %73 : vector<8x8xf32>
    %cst_58 = arith.constant dense<0.000000e+00> : vector<8xf32>
    %75 = vector.multi_reduction <add>, %74, %cst_58 [1] : vector<8x8xf32> to vector<8xf32>
    %76 = vector.shape_cast %75 : vector<8xf32> to vector<8x1xf32>
    %77 = tpu.reciprocal %76 {approx = true} : vector<8x1xf32> -> vector<8x1xf32>
    %78 = vector.broadcast %77 : vector<8x1xf32> to vector<8x8xf32>
    %79 = arith.mulf %74, %78 : vector<8x8xf32>
    %80 = arith.truncf %79 : vector<8x8xf32> to vector<8x8xbf16>
    %cst_59 = arith.constant dense<0.000000e+00> : vector<8x8xf32>
    %81 = tpu.matmul %80, %68, %cst_59 {dimension_numbers = #tpu.dot_dimension_numbers<[1], [0], [0], [1], [0, 0, 1, 1], [], []>} : vector<8x8xbf16>, vector<8x8xbf16>, vector<8x8xf32> -> vector<8x8xf32>
    %82 = arith.truncf %81 : vector<8x8xf32> to vector<8x8xbf16>
    %c0_60 = arith.constant 0 : index
    %c16_61 = arith.constant 16 : index
    %83 = vector.load %arg17[%c0_60, %c16_61] : memref<8x32xbf16, #tpu.memory_space<vmem>>, vector<8x8xbf16>
    tpu.vector_store %arg17[%c0_60, %c16_61], %82 {strides = array<i32>} : memref<8x32xbf16, #tpu.memory_space<vmem>>, vector<8x8xbf16>,
    %c0_62 = arith.constant 0 : index
    %c24 = arith.constant 24 : index
    %84 = vector.load %arg14[%c0_62, %c24] : memref<8x32xbf16, #tpu.memory_space<vmem>>, vector<8x8xbf16>
    %c0_63 = arith.constant 0 : index
    %c24_64 = arith.constant 24 : index
    %85 = vector.load %arg15[%c0_63, %c24_64] : memref<8x32xbf16, #tpu.memory_space<vmem>>, vector<8x8xbf16>
    %c0_65 = arith.constant 0 : index
    %c24_66 = arith.constant 24 : index
    %86 = vector.load %arg16[%c0_65, %c24_66] : memref<8x32xbf16, #tpu.memory_space<vmem>>, vector<8x8xbf16>
    %cst_67 = arith.constant dense<0.000000e+00> : vector<8x8xf32>
    %87 = tpu.matmul %84, %85, %cst_67 {dimension_numbers = #tpu.dot_dimension_numbers<[1], [1], [0], [0], [0, 0, 1, 0], [], []>} : vector<8x8xbf16>, vector<8x8xbf16>, vector<8x8xf32> -> vector<8x8xf32>
    %cst_68 = arith.constant dense<0xFF800000> : vector<8xf32>
    %88 = vector.multi_reduction <maximumf>, %87, %cst_68 [1] : vector<8x8xf32> to vector<8xf32>
    %89 = vector.shape_cast %88 : vector<8xf32> to vector<8x1xf32>
    %90 = vector.broadcast %89 : vector<8x1xf32> to vector<8x8xf32>
    %91 = arith.subf %87, %90 : vector<8x8xf32>
    %92 = math.exp %91 : vector<8x8xf32>
    %cst_69 = arith.constant dense<0.000000e+00> : vector<8xf32>
    %93 = vector.multi_reduction <add>, %92, %cst_69 [1] : vector<8x8xf32> to vector<8xf32>
    %94 = vector.shape_cast %93 : vector<8xf32> to vector<8x1xf32>
    %95 = tpu.reciprocal %94 {approx = true} : vector<8x1xf32> -> vector<8x1xf32>
    %96 = vector.broadcast %95 : vector<8x1xf32> to vector<8x8xf32>
    %97 = arith.mulf %92, %96 : vector<8x8xf32>
    %98 = arith.truncf %97 : vector<8x8xf32> to vector<8x8xbf16>
    %cst_70 = arith.constant dense<0.000000e+00> : vector<8x8xf32>
    %99 = tpu.matmul %98, %86, %cst_70 {dimension_numbers = #tpu.dot_dimension_numbers<[1], [0], [0], [1], [0, 0, 1, 1], [], []>} : vector<8x8xbf16>, vector<8x8xbf16>, vector<8x8xf32> -> vector<8x8xf32>
    %100 = arith.truncf %99 : vector<8x8xf32> to vector<8x8xbf16>
    %c0_71 = arith.constant 0 : index
    %c24_72 = arith.constant 24 : index
    %101 = vector.load %arg17[%c0_71, %c24_72] : memref<8x32xbf16, #tpu.memory_space<vmem>>, vector<8x8xbf16>
    tpu.vector_store %arg17[%c0_71, %c24_72], %100 {strides = array<i32>} : memref<8x32xbf16, #tpu.memory_space<vmem>>, vector<8x8xbf16>,
    %c0_73 = arith.constant 0 : index
    %c0_74 = arith.constant 0 : index
    %102 = vector.load %arg17[%c0_73, %c0_74] : memref<8x32xbf16, #tpu.memory_space<vmem>>, vector<8x32xbf16>
    %c0_75 = arith.constant 0 : index
    %c0_76 = arith.constant 0 : index
    %103 = vector.load %arg11[%c0_75, %c0_76] : memref<32x32xbf16, #tpu.memory_space<vmem>>, vector<32x32xbf16>
    %cst_77 = arith.constant dense<0.000000e+00> : vector<8x32xf32>
    %104 = tpu.matmul %102, %103, %cst_77 {dimension_numbers = #tpu.dot_dimension_numbers<[1], [0], [0], [1], [0, 0, 1, 1], [], []>} : vector<8x32xbf16>, vector<32x32xbf16>, vector<8x32xf32> -> vector<8x32xf32>
    %c0_78 = arith.constant 0 : index
    %c0_79 = arith.constant 0 : index
    %105 = vector.load %arg12[%c0_78, %c0_79] : memref<1x32xf32, #tpu.memory_space<vmem>>, vector<1x32xf32>
    %106 = vector.broadcast %105 : vector<1x32xf32> to vector<8x32xf32>
    %107 = arith.addf %104, %106 : vector<8x32xf32>
    %c0_80 = arith.constant 0 : index
    %c0_81 = arith.constant 0 : index
    %c0_82 = arith.constant 0 : index
    %108 = vector.load %arg13[%c0_80, %c0_81, %c0_82] : memref<1x8x32xf32, #tpu.memory_space<vmem>>, vector<1x8x32xf32>
    %109 = vector.shape_cast %108 : vector<1x8x32xf32> to vector<8x32xf32>
    %110 = vector.shape_cast %107 : vector<8x32xf32> to vector<1x8x32xf32>
    tpu.vector_store %arg13[%c0_80, %c0_81, %c0_82], %110 {strides = array<i32>} : memref<1x8x32xf32, #tpu.memory_space<vmem>>, vector<1x8x32xf32>,
    return
  }
  func.func @transform_0(%arg0: i32, %arg1: i32) -> (i32, i32, i32) {
    %c0_i32 = arith.constant 0 : i32
    %c0_i32_0 = arith.constant 0 : i32
    return %arg0, %arg1, %c0_i32 : i32, i32, i32
  }
  func.func @transform_1(%arg0: i32, %arg1: i32) -> (i32, i32, i32) {
    %c0_i32 = arith.constant 0 : i32
    %c0_i32_0 = arith.constant 0 : i32
    %c0_i32_1 = arith.constant 0 : i32
    return %arg0, %c0_i32, %c0_i32_0 : i32, i32, i32
  }
  func.func @transform_2(%arg0: i32, %arg1: i32) -> (i32, i32, i32) {
    %c0_i32 = arith.constant 0 : i32
    %c0_i32_0 = arith.constant 0 : i32
    %c0_i32_1 = arith.constant 0 : i32
    return %arg0, %c0_i32, %c0_i32_0 : i32, i32, i32
  }
  func.func @transform_3(%arg0: i32, %arg1: i32) -> (i32, i32) {
    %c0_i32 = arith.constant 0 : i32
    %c0_i32_0 = arith.constant 0 : i32
    %c0_i32_1 = arith.constant 0 : i32
    return %c0_i32, %c0_i32_0 : i32, i32
  }
  func.func @transform_4(%arg0: i32, %arg1: i32) -> (i32, i32) {
    %c0_i32 = arith.constant 0 : i32
    %c0_i32_0 = arith.constant 0 : i32
    %c0_i32_1 = arith.constant 0 : i32
    return %c0_i32, %c0_i32_0 : i32, i32
  }
  func.func @transform_5(%arg0: i32, %arg1: i32) -> (i32, i32) {
    %c0_i32 = arith.constant 0 : i32
    %c0_i32_0 = arith.constant 0 : i32
    %c0_i32_1 = arith.constant 0 : i32
    return %c0_i32, %c0_i32_0 : i32, i32
  }
  func.func @transform_6(%arg0: i32, %arg1: i32) -> (i32, i32) {
    %c0_i32 = arith.constant 0 : i32
    %c0_i32_0 = arith.constant 0 : i32
    %c0_i32_1 = arith.constant 0 : i32
    return %c0_i32, %c0_i32_0 : i32, i32
  }
  func.func @transform_7(%arg0: i32, %arg1: i32) -> (i32, i32) {
    %c0_i32 = arith.constant 0 : i32
    %c0_i32_0 = arith.constant 0 : i32
    %c0_i32_1 = arith.constant 0 : i32
    return %c0_i32, %c0_i32_0 : i32, i32
  }
  func.func @transform_8(%arg0: i32, %arg1: i32) -> (i32, i32) {
    %c0_i32 = arith.constant 0 : i32
    %c0_i32_0 = arith.constant 0 : i32
    %c0_i32_1 = arith.constant 0 : i32
    return %c0_i32, %c0_i32_0 : i32, i32
  }
  func.func @transform_9(%arg0: i32, %arg1: i32) -> (i32, i32) {
    %c0_i32 = arith.constant 0 : i32
    %c0_i32_0 = arith.constant 0 : i32
    %c0_i32_1 = arith.constant 0 : i32
    return %c0_i32, %c0_i32_0 : i32, i32
  }
  func.func @transform_10(%arg0: i32, %arg1: i32) -> (i32, i32) {
    %c0_i32 = arith.constant 0 : i32
    %c0_i32_0 = arith.constant 0 : i32
    %c0_i32_1 = arith.constant 0 : i32
    return %c0_i32, %c0_i32_0 : i32, i32
  }
  func.func @transform_11(%arg0: i32, %arg1: i32) -> (i32, i32, i32) {
    %c0_i32 = arith.constant 0 : i32
    %c0_i32_0 = arith.constant 0 : i32
    return %arg0, %arg1, %c0_i32 : i32, i32, i32
  }
}

</mosaic_0001>

<bundles_post_ra>
// kernel: tpu_custom_call.1
= control target key start
LH: loop header
LB: loop body
LE: loop exit
PB: predicated region body
PF: predicated region fallthrough
CT: control target
= control target key end

     0   :  { %s2591_s0 = inlined_call_operand.hbm [shape: f32[2,8,32], index: 0, kind: input, shape index: {}]   ;;  %s2592_s1 = inlined_call_operand.hbm [shape: f32[2,8,32], index: 1, kind: input, shape index: {}]   ;;  %s2593_s2 = inlined_call_operand.hbm [shape: f32[2,8,32], index: 2, kind: input, shape index: {}]   ;;  %s2594_s3 = inlined_call_operand.hbm [shape: bf16[32,32], index: 3, kind: input, shape index: {}]   ;;  %s2595_s4 = inlined_call_operand.vmem [shape: f32[1,32], index: 4, kind: input, shape index: {}]   ;;  %s2596_s5 = inlined_call_operand.vmem [shape: bf16[32,32], index: 5, kind: input, shape index: {}]   ;;  %s2597_s6 = inlined_call_operand.vmem [shape: f32[1,32], index: 6, kind: input, shape index: {}]   ;;  %s2598_s7 = inlined_call_operand.hbm [shape: bf16[32,32], index: 7, kind: input, shape index: {}]   ;;  %s2599_s8 = inlined_call_operand.hbm [shape: f32[1,32], index: 8, kind: input, shape index: {}]   ;;  %s2600_s9 = inlined_call_operand.vmem [shape: bf16[32,32], index: 9, kind: input, shape index: {}]   ;;  %s2601_s10 = inlined_call_operand.vmem [shape: f32[1,32], index: 10, kind: input, shape index: {}]   ;;  %s2602_s11 = inlined_call_operand.hbm [shape: f32[2,8,32], index: 11, kind: output, shape index: {}]  }
   0x1   :  { %2628 = sst [smem:[#allocation31_spill]] %s2592_s1 }
   0x2   :  { %2629 = sst [smem:[#allocation32_spill]] %s2594_s3 }
   0x3   :  { %2630 = sst [smem:[#allocation33_spill]] %s2595_s4 }
   0x4   :  { %2631 = sst [smem:[#allocation34_spill]] %s2597_s6 }
   0x5   :  { %2632 = sst [smem:[#allocation35_spill]] %s2600_s9 }
   0x6   :  { %2633 = sst [smem:[#allocation36_spill]] %s2601_s10 }
   0x7   :  { %2634 = sst [smem:[#allocation37_spill]] %s2602_s11 }
   0x8   :  { %16 = vsyncpa [#allocation7], 0 }
   0x9   :  { %18 = vsyncpa [#allocation7 + $0x1], 0 }
   0xa   :  { %19 = vsyncpa [#allocation10], 0 }
   0xb   :  { %21 = vsyncpa [#allocation10 + $0x1], 0 }
   0xc   :  { %22 = vsyncpa [#allocation13], 0 }
   0xd   :  { %23 = vsyncpa [#allocation16], 0 }
   0xe   :  { %24 = vsyncpa [#allocation8], 0 }
   0xf   :  { %26 = vsyncpa [#allocation8 + $0x1], 0  ;;  %s2150_s17 = smov 0   ;;  %s2152_s18 = smov 0  }
  0x10   :  { %s2154_s19 = smov 0   ;;  %s2156_s20 = smov 0  }
  0x11   :  { %s2158_s21 = smov 0   ;;  %s2160_s22 = smov 0  }
  0x12 LB: > { %2635 = sst [smem:[#allocation23_spill]] %s2051_s17  ;;  %s2181_s23 = sadd.s32 4294967295, %s2071_s22   ;;  %s2071_s22 = sphi %s2160_s22, %s32_s22   ;;  %s2067_s21 = sphi %s2158_s21, %s2684_s21   ;;  %s2063_s20 = sphi %s2156_s20, %s2683_s20   ;;  %s2059_s19 = sphi %s2154_s19, %s2687_s19   ;;  %s2055_s18 = sphi %s2152_s18, %s2686_s18   ;;  %s2051_s17 = sphi %s2150_s17, %s2685_s17  }
  0x13   : > { %2636 = sst [smem:[#allocation24_spill]] %s2063_s20  ;;  %s1486_s24 = sadd.s32 4294967294, %s2071_s22  }
  0x14   : > { %2637 = sst [smem:[#allocation25_spill]] %s2067_s21  ;;  %p66_p0 = scmp.ne.s32.totalorder %s2055_s18, %s2051_s17 }
  0x15   : > { %2638 = sst [smem:[#allocation26_spill]] %s2071_s22  ;;  %p2605_p1 = scmp.eq.s32.totalorder %s2181_s23, 0 }
  0x16   : > { %p318_p3 = scmp.eq.s32.totalorder %s1486_s24, 1  ;;  %p1487_p5 = scmp.ge.s32.totalorder %s2071_s22, 1 }
  0x17   : > { %p2190_p4 = por %p2605_p1, %p66_p0  ;;  %p325_p7 = scmp.lt.s32.totalorder %s2071_s22, 3 }
  0x18   : > { %p2195_p6 = por %p318_p3, %p66_p0  ;;  %s2073_s28 = smov [#allocation12]  }
  0x19   : > { %s2639_s25 = scalar_select %p2190_p4, 1, 0 }
  0x1a   : > { %s2640_s26 = scalar_select %p2195_p6, 1, 0 }
  0x1b   : > { %p2200_p8 = pnand %p1487_p5, %p325_p7  ;;  %s337_s29 = sshll.u32 %s2073_s28, 4  ;;  %s338_s29 = int_to_ptr.vmem [resolvable:$true] %s337_s29 }
  0x1c   : > { %2641 = sst [smem:[#allocation27_spill]] %s2640_s26  ;;  %s44_s12 = sadd.s32 1, %s2067_s21 }
  0x1d   : > { %s2642_s27 = scalar_select %p2200_p8, 1, 0 }
  0x1e   : > { %p1677_p9 = pneg %p2200_p8  ;;  %s2644_s3 = sld [smem:[#allocation32_spill]] }
  0x20   : > { %p2209_p11 = pnand %p1677_p9, %p2605_p1 }
  0x22   : > { %s2643_s30 = scalar_select %p2209_p11, 1, 0 }
  0x23   : > { %p2222_p13 = pneg %p2209_p11 }
  0x24   : > { %s1803_s15 = scalar_lea.hbm %s2644_s3, 256 }
  0x25   : > { %p1804_p12 = scmp.ne.s32.totalorder %s2644_s3, %s1803_s15  ;;  %p1810_p5 = scmp.lt.u32.totalorder %s1803_s15, %s2644_s3 }
  0x26   : > { %s2645_s28 = scalar_select %p2222_p13, 1, 0 }
  0x27   : > { %p1806_p0 = pnand %p2222_p13, %p1804_p12 }
  0x29   : > { %p1807_p3 = pneg %p1806_p0 }
  0x2b   : > { %p1812_p7 = pnand %p1810_p5, %p1807_p3 }
  0x2d   : > { %1815 = shalt.err (!%p1812_p7)
}
  0x2e   : > { %s1816_s13 = scalar_lea.vmem %s338_s29, 256  ;;  %p1824_p2 = scmp.lt.s32.totalorder %s338_s29, %s338_s29 }
  0x2f   : > { %p1817_p9 = scmp.ne.s32.totalorder %s338_s29, %s1816_s13  ;;  %p1825_p6 = scmp.lt.s32.totalorder %s1816_s13, %s1816_s13 }
  0x31   : > { %p1819_p10 = pnand %p1817_p9, %p2222_p13  ;;  %p1826_p4 = por %p1825_p6, %p1824_p2 }
  0x33   : > { %p1820_p1 = pneg %p1819_p10 }
  0x35   : > { %p1827_p8 = pnand %p1826_p4, %p1820_p1 }
  0x37   : > { %1830 = shalt.err (!%p1827_p8)
}
  0x38   : > { %s2609_s14 = smov 64   ;;  %s2610_s17 = smov 4  }
  0x39   : > { %1680 = dma.hbm_to_vmem [thread:$0]  (!%p2209_p11), %s2644_s3, 256, %s338_s29, [#allocation13], %s2609_s14, %s2609_s14, %s2610_s17  }
  0x3a   : > { %p46_p1 = scmp.ge.s32.totalorder %s44_s12, 2  ;;  %s53_s16 = sadd.s32 1, %s2059_s19 }
  0x3b   : > { %p60_p2 = scmp.ne.s32.totalorder %s2059_s19, %s2055_s18  ;;  %p61_p4 = scmp.eq.s32.totalorder %s2071_s22, 0 }
  0x3c   : > { %s2689_s12 = smov (%p46_p1, %s44_s12), 0  ;;  %p2647_p8 = scmp.eq.s32.totalorder %s2181_s23, 1 }
  0x3d   : > { %2646 = sst [smem:[#allocation28_spill]] %s2689_s12  ;;  %p62_p6 = por %p61_p4, %p60_p2 }
  0x3e   : > { %p2249_p10 = por %p2647_p8, %p60_p2  ;;  %s48_s13 = ssub.s32 %s2067_s21, %s2689_s12 }
  0x3f   : > { %p1704_p12 = scmp.lt.s32.totalorder %s2071_s22, 2  ;;  %p51_p0 = scmp.eq.s32.totalorder %s48_s13, 0 }
  0x40   : > { %s2648_s24 = scalar_select %p2249_p10, 1, 0 }
  0x41   : > { %s2612_s11 = sand.u32 1, %s2059_s19   ;;  %s2262_s26 = sshll.u32 %s2067_s21, 7 }
  0x42   : > { %2649 = sst [smem:[#allocation29_spill]] %s2648_s24  ;;  %s2259_s29 = sshll.u32 %s2612_s11, 3 }
  0x43   : > { %s2265_s15 = scalar_select %p51_p0, %s2059_s19, %s53_s16  }
  0x44   : > { %p2267_p3 = pnand %p1704_p12, %p62_p6  ;;  %s409_s17 = sand.u32 1, %s2071_s22  }
  0x45   : > { %2650 = sst [smem:[#allocation30_spill]] %s2265_s15  ;;  %s2652_s1 = sld [smem:[#allocation31_spill]] }
  0x46   : > { %s2651_s14 = scalar_select %p2267_p3, 1, 0 }
  0x47   : > { %s413_s11 = scalar_lea.vmem [#allocation9], %s2259_s29  ;;  %s2076_s16 = smov [#allocation14]  }
  0x48   : > { %s420_s21 = sshll.u32 %s413_s11, 4  ;;  %s2281_s15 = sshll.u32 %s2076_s16, 4  ;;  %s2279_s21 = int_to_ptr.vmem [resolvable:$true] %s420_s21  ;;  %s360_s15 = int_to_ptr.vmem [resolvable:$true] %s2281_s15 }
  0x49   : > { %s2283_s24 = scalar_lea.sflag [#allocation10], %s409_s17  ;;  %p2289_p7 = pneg %p2267_p3 }
  0x4b   : > { %s2276_s13 = scalar_lea.hbm %s2652_s1, %s2262_s26  ;;  %s1836_s22 = scalar_lea.hbm %s2652_s1, 256 }
  0x4c   : > { %s1831_s10 = scalar_lea.hbm %s2276_s13, 128  ;;  %p1837_p2 = scmp.lt.u32.totalorder %s2276_s13, %s2652_s1 }
  0x4d   : > { %p1832_p5 = scmp.ne.s32.totalorder %s2276_s13, %s1831_s10  ;;  %p1838_p4 = scmp.lt.u32.totalorder %s1836_s22, %s1831_s10 }
  0x4e   : > { %s2653_s3 = scalar_select %p2289_p7, 1, 0 }
  0x4f   : > { %p1834_p9 = pnand %p2289_p7, %p1832_p5  ;;  %p1839_p6 = por %p1838_p4, %p1837_p2 }
  0x50   : > { %p1840_p8 = scmp.lt.u32.totalorder %s1831_s10, %s2276_s13 }
  0x51   : > { %p1835_p1 = pneg %p1834_p9 }
  0x52   : > { %p1841_p12 = por %p1840_p8, %p1839_p6 }
  0x54   : > { %p1842_p0 = pnand %p1841_p12, %p1835_p1 }
  0x56   : > { %1845 = shalt.err (!%p1842_p0)
}
  0x57   : > { %s1846_s17 = scalar_lea.vmem %s2279_s21, 128  ;;  %s2077_s12 = smov [#allocation9]  }
  0x58   : > { %p1847_p5 = scmp.ne.s32.totalorder %s2279_s21, %s1846_s17  ;;  %s1851_s11 = sshll.u32 %s2077_s12, 4  ;;  %s1852_s11 = int_to_ptr.vmem [resolvable:$false] %s1851_s11 }
  0x59   : > { %s1853_s20 = scalar_lea.vmem %s1852_s11, 256  ;;  %p1854_p11 = scmp.lt.s32.totalorder %s2279_s21, %s1852_s11 }
  0x5a   : > { %p1849_p9 = pnand %p1847_p5, %p2289_p7  ;;  %p1855_p13 = scmp.lt.s32.totalorder %s1853_s20, %s1846_s17 }
  0x5c   : > { %p1850_p10 = pneg %p1849_p9  ;;  %p1856_p2 = por %p1855_p13, %p1854_p11 }
  0x5e   : > { %p1857_p4 = pnand %p1856_p2, %p1850_p10 }
  0x60   : > { %1860 = shalt.err (!%p1857_p4)
}
  0x61   : > { %1693 = dma.hbm_to_vmem [thread:$0]  (!%p2267_p3), %s2276_s13, 128, %s2279_s21, %s2283_s24  }
  0x62   : > { %s1861_s16 = scalar_lea.hbm %s2598_s7, 256  ;;  %p2654_p11 = scmp.ne.s32.totalorder %s2645_s28, 0 }
  0x63   : > { %p1862_p1 = scmp.ne.s32.totalorder %s2598_s7, %s1861_s16  ;;  %p1868_p6 = scmp.lt.u32.totalorder %s1861_s16, %s2598_s7 }
  0x65   : > { %p1864_p13 = pnand %p1862_p1, %p2654_p11 }
  0x67   : > { %p1865_p10 = pneg %p1864_p13 }
  0x69   : > { %p1870_p8 = pnand %p1868_p6, %p1865_p10 }
  0x6b   : > { %1873 = shalt.err (!%p1870_p8)
}
  0x6c   : > { %s1874_s20 = scalar_lea.vmem %s360_s15, 256  ;;  %p1882_p9 = scmp.lt.s32.totalorder %s360_s15, %s360_s15 }
  0x6d   : > { %p1875_p12 = scmp.ne.s32.totalorder %s360_s15, %s1874_s20  ;;  %p1883_p2 = scmp.lt.s32.totalorder %s1874_s20, %s1874_s20 }
  0x6f   : > { %p1877_p0 = pnand %p1875_p12, %p2654_p11  ;;  %p1884_p4 = por %p1883_p2, %p1882_p9 }
  0x71   : > { %p1878_p5 = pneg %p1877_p0 }
  0x73   : > { %p1885_p3 = pnand %p1884_p4, %p1878_p5 }
  0x75   : > { %1888 = shalt.err (!%p1885_p3)
}
  0x76   : > { %p2655_p1 = scmp.ne.s32.totalorder %s2643_s30, 0  ;;  %s2656_s1 = smov 4  }
  0x77   : > { %s2657_s21 = smov 64   ;;  %s2078_s22 = smov [#allocation15]  }
  0x78   : > { %1683 = dma.hbm_to_vmem [thread:$0]  (!%p2655_p1), %s2598_s7, 256, %s360_s15, [#allocation13], %s2657_s21, %s2657_s21, %s2656_s1  }
  0x79   : > { %s373_s16 = sshll.u32 %s2078_s22, 4  ;;  %s1889_s11 = scalar_lea.hbm %s2599_s8, 16  ;;  %s374_s16 = int_to_ptr.vmem [resolvable:$true] %s373_s16 }
  0x7a   : > { %p1890_p3 = scmp.ne.s32.totalorder %s2599_s8, %s1889_s11  ;;  %p1896_p6 = scmp.lt.u32.totalorder %s1889_s11, %s2599_s8 }
  0x7c   : > { %p1892_p13 = pnand %p1890_p3, %p2654_p11 }
  0x7e   : > { %p1893_p10 = pneg %p1892_p13 }
  0x80   : > { %p1898_p8 = pnand %p1896_p6, %p1893_p10 }
  0x82   : > { %1901 = shalt.err (!%p1898_p8)
}
  0x83   : > { %s1902_s15 = scalar_lea.vmem %s374_s16, 16  ;;  %s1909_s1 = scalar_lea.vmem %s374_s16, 32 }
  0x84   : > { %p1903_p12 = scmp.ne.s32.totalorder %s374_s16, %s1902_s15  ;;  %p1910_p9 = scmp.lt.s32.totalorder %s374_s16, %s374_s16 }
  0x85   : > { %p1911_p2 = scmp.lt.s32.totalorder %s1909_s1, %s1902_s15 }
  0x86   : > { %p1905_p0 = pnand %p1903_p12, %p2654_p11 }
  0x87   : > { %p1912_p4 = por %p1911_p2, %p1910_p9 }
  0x88   : > { %p1906_p5 = pneg %p1905_p0 }
  0x8a   : > { %p1913_p7 = pnand %p1912_p4, %p1906_p5 }
  0x8c   : > { %1916 = shalt.err (!%p1913_p7)
}
  0x8d   : > { %1686 = dma.hbm_to_vmem [thread:$0]  (!%p2655_p1), %s2599_s8, 16, %s374_s16, [#allocation16]  }
  0x8e   : > { %s2357_s28 = scalar_lea.hbm %s2591_s0, %s2262_s26  ;;  %s394_s13 = scalar_lea.vmem [#allocation6], %s2259_s29 }
  0x8f   : > { %s402_s10 = sshll.u32 %s394_s13, 4  ;;  %s2658_s30 = sand.u32 1, %s2059_s19   ;;  %s403_s10 = int_to_ptr.vmem [resolvable:$true] %s402_s10 }
  0x90   : > { %s391_s22 = scalar_lea.sflag [#allocation7], %s2658_s30  ;;  %s1917_s12 = scalar_lea.hbm %s2357_s28, 128 }
  0x91   : > { %p1918_p7 = scmp.ne.s32.totalorder %s2357_s28, %s1917_s12  ;;  %p2659_p11 = scmp.ne.s32.totalorder %s2653_s3, 0 }
  0x92   : > { %s1922_s11 = scalar_lea.hbm %s2591_s0, 256  ;;  %p1923_p1 = scmp.lt.u32.totalorder %s2357_s28, %s2591_s0 }
  0x93   : > { %p1920_p3 = pnand %p1918_p7, %p2659_p11  ;;  %p1924_p10 = scmp.lt.u32.totalorder %s1922_s11, %s1917_s12 }
  0x94   : > { %p1926_p8 = scmp.lt.u32.totalorder %s1917_s12, %s2357_s28 }
  0x95   : > { %p1921_p13 = pneg %p1920_p3  ;;  %p1925_p6 = por %p1924_p10, %p1923_p1 }
  0x97   : > { %p1927_p12 = por %p1926_p8, %p1925_p6 }
  0x99   : > { %p1928_p0 = pnand %p1927_p12, %p1921_p13 }
  0x9b   : > { %1931 = shalt.err (!%p1928_p0)
}
  0x9c   : > { %s1932_s1 = scalar_lea.vmem %s403_s10, 128  ;;  %s2079_s9 = smov [#allocation6]  }
  0x9d   : > { %p1933_p5 = scmp.ne.s32.totalorder %s403_s10, %s1932_s1  ;;  %s1937_s21 = sshll.u32 %s2079_s9, 4  ;;  %s1938_s21 = int_to_ptr.vmem [resolvable:$false] %s1937_s21 }
  0x9e   : > { %s1939_s4 = scalar_lea.vmem %s1938_s21, 256  ;;  %p1940_p4 = scmp.lt.s32.totalorder %s403_s10, %s1938_s21 }
  0x9f   : > { %p1935_p9 = pnand %p1933_p5, %p2659_p11  ;;  %p1941_p7 = scmp.lt.s32.totalorder %s1939_s4, %s1932_s1 }
  0xa1   : > { %p1936_p2 = pneg %p1935_p9  ;;  %p1942_p3 = por %p1941_p7, %p1940_p4 }
  0xa3   : > { %p1943_p1 = pnand %p1942_p3, %p1936_p2 }
  0xa5   : > { %1946 = shalt.err (!%p1943_p1)
}
  0xa6   : > { %p2660_p10 = scmp.ne.s32.totalorder %s2651_s14, 0  ;;  %s2383_s30 = scalar_lea.hbm %s2593_s2, %s2262_s26 }
  0xa7   : > { %s431_s12 = scalar_lea.vmem [#allocation11], %s2259_s29  ;;  %s1947_s17 = scalar_lea.hbm %s2383_s30, 128 }
  0xa8   : > { %1690 = dma.hbm_to_vmem [thread:$0]  (!%p2660_p10), %s2357_s28, 128, %s403_s10, %s391_s22  }
  0xa9   : > { %s438_s16 = sshll.u32 %s431_s12, 4  ;;  %p1948_p13 = scmp.ne.s32.totalorder %s2383_s30, %s1947_s17  ;;  %s439_s16 = int_to_ptr.vmem [resolvable:$true] %s438_s16 }
  0xaa   : > { %s1952_s28 = scalar_lea.hbm %s2593_s2, 256  ;;  %p1953_p12 = scmp.lt.u32.totalorder %s2383_s30, %s2593_s2 }
  0xab   : > { %p1950_p6 = pnand %p1948_p13, %p2659_p11  ;;  %p1954_p0 = scmp.lt.u32.totalorder %s1952_s28, %s1947_s17 }
  0xac   : > { %p1956_p9 = scmp.lt.u32.totalorder %s1947_s17, %s2383_s30 }
  0xad   : > { %p1951_p8 = pneg %p1950_p6  ;;  %p1955_p5 = por %p1954_p0, %p1953_p12 }
  0xaf   : > { %p1957_p2 = por %p1956_p9, %p1955_p5 }
  0xb1   : > { %p1958_p4 = pnand %p1957_p2, %p1951_p8 }
  0xb3   : > { %1961 = shalt.err (!%p1958_p4)
}
  0xb4   : > { %s1962_s29 = scalar_lea.vmem %s439_s16, 128  ;;  %s2080_s26 = smov [#allocation11]  }
  0xb5   : > { %p1963_p7 = scmp.ne.s32.totalorder %s439_s16, %s1962_s29  ;;  %s1967_s15 = sshll.u32 %s2080_s26, 4  ;;  %s1968_s15 = int_to_ptr.vmem [resolvable:$false] %s1967_s15 }
  0xb6   : > { %s1969_s1 = scalar_lea.vmem %s1968_s15, 256  ;;  %p1970_p13 = scmp.lt.s32.totalorder %s439_s16, %s1968_s15 }
  0xb7   : > { %p1965_p3 = pnand %p1963_p7, %p2659_p11  ;;  %p1971_p6 = scmp.lt.s32.totalorder %s1969_s1, %s1962_s29 }
  0xb9   : > { %p1966_p1 = pneg %p1965_p3  ;;  %p1972_p10 = por %p1971_p6, %p1970_p13 }
  0xbb   : > { %p1973_p0 = pnand %p1972_p10, %p1966_p1 }
  0xbd   : > { %1976 = shalt.err (!%p1973_p0)
}
  0xbe   : > { %p2661_p12 = scmp.ne.s32.totalorder %s2651_s14, 0  ;;  %p2662_p8 = scmp.ne.s32.totalorder %s2642_s27, 0 }
  0xbf   : > { %s2407_s3 = sand.u32 (!%p2662_p8), 1, %s2055_s18   ;;  %p2663_p11 = scmp.ne.s32.totalorder (!%p2662_p8), %s2639_s25, 0 }
  0xc0   : > { %1696 = dma.hbm_to_vmem [thread:$0]  (!%p2661_p12), %s2383_s30, 128, %s439_s16, %s2283_s24  }
  0xc1   : > { %447 = sbr.rel (%p2662_p8) target bundleno = 1680 (0x690), region = 64  ;;  %s2410_s9 = sshll.u32 (!%p2662_p8), %s2407_s3, 3 }
  0xc2   : > { %s450_s21 = scalar_lea.sflag (!%p2662_p8), [#allocation7], %s2407_s3  ;;  %s453_s4 = scalar_lea.vmem (!%p2662_p8), [#allocation6], %s2410_s9 }
  0xc8   : > { %2030 = dma.done.wait (%p2663_p11), %s450_s21, 128  }
  0xc9   : > { %2032 = vsyncadd (%p2663_p11), %s450_s21, 4294967168  ;;  %s458_s27 = sand.u32 1, %s2181_s23   ;;  %s462_s24 = scalar_lea.vmem [#allocation9], %s2410_s9 }
  0xca   : > { %s459_s14 = scalar_lea.sflag [#allocation10], %s458_s27 }
  0xcb   : > { %2034 = dma.done.wait (%p2663_p11), %s459_s14, 256  }
  0xcc   : > { %2036 = vsyncadd (%p2663_p11), %s459_s14, 4294967040  ;;  %s471_s6 = scalar_lea.vmem [#allocation11], %s2410_s9  ;;  %p2664_p10 = scmp.eq.s32.totalorder %s2181_s23, 0 }
  0xce   : > { %2038 = dma.done.wait (%p2664_p10), [#allocation13], 512   ;;  %p2665_p5 = pmov %p2664_p10 }
  0xd0   : > { %2040 = vsyncadd (%p2665_p5), [#allocation13], 4294966784  ;;  %p2666_p9 = pmov %p2665_p5 }
  0xd1   : > { %p2667_p2 = pmov %p2665_p5 }
  0xd2   : > { %2042 = dma.done.wait (%p2666_p9), [#allocation16], 16  }
  0xd3   : > { %2044 = vsyncadd (%p2667_p2), [#allocation16], 4294967280  ;;  %v2081_v0 = vmov 0.0   ;;  %vm2082_vm0 = vmmov 0   ;;  %v1770_v1 = vld [vmem:[%s2596_s5] sm:$0xff]   ;;  %v1772_v3 = vld [vmem:[%s2596_s5 + $0x8] sm:$0xff]  }
  0xd4   : > { %1585 = vmatprep.subr.bf16.mxu1 %v2081_v0  ;;  %1577 = vmatprep.subr.bf16.mxu0 %v2081_v0  ;;  %v1771_v2 = vld [vmem:[#allocation12] sm:$0xff]   ;;  %vm558_vm1 = vcmask 261120   ;;  %v1773_v5 = vld [vmem:[#allocation12 + $0x8] sm:$0xff]   ;;  %v533_v6 = vld [vmem:[%s453_s4] sm:$0xff]  ;;  %s2668_s17 = sld [smem:[#allocation34_spill]]  ;;  %s2669_s28 = sld [smem:[#allocation33_spill]] }
  0xd5   : > { %1589 = vmatprep.mubr.msk.bf16.mxu1 %vm2082_vm0, %v2081_v0  ;;  %1581 = vmatprep.mubr.msk.bf16.mxu0 %vm2082_vm0, %v2081_v0  ;;  %v605_v4 = vld [vmem:[%s462_s24] sm:$0xff]  ;;  %v534_v8 = vpack.c.bf16 %v533_v6, %v533_v6  ;;  %vm603_vm2 = vcmask 257024   ;;  %vm748_vm3 = vcmask 64512   ;;  %s2083_s10 = smov 112   ;;  %s2084_s22 = smov 120   ;;  %v1780_v32 = vld [vmem:[#allocation14] sm:$0xff]  }
  0xd6   : > { %1586 = vmatpush3.bf16.msra.mxu1 %v1770_v1  ;;  %1578 = vmatpush3.bf16.msra.mxu0 %v1771_v2  ;;  %v606_v7 = vpack.c.bf16 %v605_v4, %v605_v4  ;;  %s2085_s29 = smov 104   ;;  %v1781_v33 = vld [vmem:[#allocation14 + $0x8] sm:$0xff]   ;;  %v1514_v50 = vld [vmem:[#allocation15] ss:$0 sm:$0xff]  ;;  %vm810_vm4 = vcmask 1043456   ;;  %vm855_vm5 = vcmask 60416  }
  0xd7   : > { %1587 = vmatprep.subr.bf16.mxu1 %v2081_v0  ;;  %1579 = vmatprep.subr.bf16.mxu0 %v2081_v0  ;;  %v675_v34 = vld [vmem:[%s471_s6] sm:$0xff]  ;;  %s2086_s26 = smov 8   ;;  %s2670_s21 = sld [smem:[#allocation35_spill]]  ;;  %vm986_vm6 = vcmask 126016   ;;  %vm1117_vm7 = vcmask 191616   ;;  %vm1248_vm8 = vcmask 257216  }
  0xd8   : > { %v676_v35 = vpack.c.bf16 %v675_v34, %v675_v34  ;;  %s2087_s24 = smov 16   ;;  %s2672_s6 = sld [smem:[#allocation24_spill]] }
  0xd9   : > { %s2088_s25 = smov 24   ;;  %s2673_s30 = sld [smem:[#allocation36_spill]] }
  0xda   : > { %1588 = vmatpush3.bf16.msra.mxu1 %v1772_v3  ;;  %1580 = vmatpush3.bf16.msra.mxu0 %v1773_v5  ;;  %v1510_v9 = vld [vmem:[%s2668_s17] ss:$0 sm:$0xff]  ;;  %s2674_s12 = sld [smem:[#allocation29_spill]]  ;;  %s531_s17 = scalar_lea.vmem [#allocation17], %s2410_s9 }
  0xdb   : > { %1601 = vmatprep.subr.bf16.mxu1 %v2081_v0  ;;  %1593 = vmatprep.subr.bf16.mxu0 %v2081_v0  ;;  %v1506_v10 = vld [vmem:[%s2669_s28] ss:$0 sm:$0xff]  ;;  %s1333_s11 = sshll.u32 %s531_s17, 4  ;;  %s2543_s11 = int_to_ptr.vmem [resolvable:$true] %s1333_s11 }
  0xdc   : > { %s1977_s9 = scalar_lea.vmem %s2543_s11, 128 }
  0xdd   : > { %1590 = vmatmul.mubr.msk.bf16.vlgmr.msra.gmra.mrb[0].mxu1 %vm558_vm1, %v606_v7  ;;  %1582 = vmatmul.mubr.msk.bf16.vlgmr.msra.gmra.mrb[0].mxu0 %vm558_vm1, %v534_v8  ;;  %s2671_s4 = smov %s2670_s21  ;;  %p1978_p4 = scmp.ne.s32.totalorder %s2543_s11, %s1977_s9 }
  0xde   : > { %1603 = vmatprep.mubr.msk.bf16.mxu1 %vm2082_vm0, %v2081_v0  ;;  %1597 = vmatprep.mubr.msk.bf16.mxu0 %vm2082_vm0, %v2081_v0  ;;  %s1543_s16 = sshll.u32 %s2672_s6, 7 }
  0xdf   : > { %1594 = vmatpush3.bf16.msra.mxu0 %v1780_v32 }
  0xe0   : > { %1595 = vmatprep.subr.bf16.mxu0 %v2081_v0  ;;  %p2676_p7 = scmp.ne.s32.totalorder %s2674_s12, 0 }
  0xe2   : > { %p1979_p3 = pnand %p1978_p4, %p2676_p7 }
  0xe3   : > { %1596 = vmatpush3.bf16.msra.mxu0 %v1781_v33 }
  0xe4   : > { %1607 = vmatprep.subr.bf16.mxu0 %v2081_v0  ;;  %p1980_p1 = pneg %p1979_p3 }
  0xe6   : > { %1598 = vmatmul.mubr.msk.bf16.vlgmr.msra.gmra.mrb[4].mxu0 %vm558_vm1, %v676_v35 }
  0xe7   : > { %1609 = vmatprep.mubr.msk.bf16.mxu0 %vm2082_vm0, %v2081_v0 }
 0x1b0   : > { %v667_v11 = vpop.f32.mrb[0].mxu1  ;;  %v596_v14 = vpop.f32.mrb[0].mxu0 }
 0x1b1   : > { %v668_v12 = vadd.f32 %v1510_v9, %v667_v11  ;;  %v1591_v13 = vpop.f32.mrb[1].mxu1  ;;  %v597_v16 = vadd.f32 %v1506_v10, %v596_v14  ;;  %v1583_v17 = vpop.f32.mrb[1].mxu0 }
 0x1b2   : > { %v670_v15 = vpop.f32.mrb[2].mxu1  ;;  %v599_v20 = vpop.f32.mrb[2].mxu0 }
 0x1b3   : > { %v673_v18 = vpack.c.bf16 %v668_v12, %v668_v12  ;;  %v1592_v19 = vpop.f32.mrb[3].mxu1  ;;  %v602_v21 = vpack.c.bf16 %v597_v16, %v597_v16  ;;  %v1584_v22 = vpop.f32.mrb[3].mxu0 }
 0x1b5   : > { %674 = vst.msk [vmem:[#allocation3] sm:$0xf] %vm603_vm2, %v673_v18  ;;  %604 = vst.msk [vmem:[#allocation2] sm:$0xf] %vm603_vm2, %v602_v21 }
 0x1b9   : > { %v737_v51 = vpop.f32.mrb[4].mxu0 }
 0x1ba   : > { %v738_v52 = vadd.f32 %v1514_v50, %v737_v51  ;;  %v1599_v53 = vpop.f32.mrb[5].mxu0 }
 0x1bb   : > { %v740_v54 = vpop.f32.mrb[6].mxu0 }
 0x1bc   : > { %v746_v23 = vld [vmem:[#allocation3] sm:$0xf]  ;;  %v1776_v27 = vld [vmem:[#allocation2] ss:$0 sps:$4 sm:$0xff]   ;;  %v743_v55 = vpack.c.bf16 %v738_v52, %v738_v52  ;;  %v1600_v56 = vpop.f32.mrb[7].mxu0 }
 0x1bd   : > { %v1774_v24 = vld [vmem:[#allocation3] ss:$0 sps:$4 sm:$0xff]   ;;  %v753_v25 = vsel %vm748_vm3, %v746_v23, 0  ;;  %v1777_v28 = vld [vmem:[#allocation2] ss:$0 sps:$4 sm:$0xff]  }
 0x1be   : > { %v1775_v26 = vld [vmem:[#allocation3] ss:$0 sps:$4 sm:$0xff]   ;;  %1602 = vmatpush3.bf16.xpose.msra.mxu1 %v753_v25  ;;  %999 = vrot.lane.b32.xlu1 %v1774_v24, %s2083_s10  ;;  %v745_v29 = vld [vmem:[#allocation2] sm:$0xf]  ;;  %744 = vst.msk [vmem:[#allocation4] sm:$0xf] %vm603_vm2, %v743_v55 }
 0x1bf   : > { %868 = vrot.lane.b32.xlu0 %v1775_v26, %s2084_s22  ;;  %1613 = vmatprep.subr.bf16.mxu1 %v2081_v0  ;;  %v1778_v30 = vld [vmem:[#allocation2] ss:$0 sps:$4 sm:$0xff]   ;;  %v1779_v31 = vld [vmem:[#allocation3] ss:$0 sps:$4 sm:$0xff]  }
 0x1c2   : > { %994 = vrot.lane.b32.xlu1 %v1776_v27, %s2083_s10 }
 0x1c3   : > { %863 = vrot.lane.b32.xlu0 %v1777_v28, %s2084_s22 }
 0x1c5   : > { %1604 = vmatmul.mubr.msk.bf16.vlgmr.msra.gmra.mrb[4].mxu1 %vm748_vm3, %v745_v29  ;;  %v747_v57 = vld [vmem:[#allocation4] sm:$0xf] }
 0x1c6   : > { %1125 = vrot.lane.b32.xlu1 %v1778_v30, %s2085_s29  ;;  %1615 = vmatprep.mubr.msk.bf16.mxu1 %vm2082_vm0, %v2081_v0  ;;  %v812_v58 = vsel %vm810_vm4, %v747_v57, 0  ;;  %v1782_v16 = vld [vmem:[#allocation4] ss:$0 sps:$4 sm:$0xff]  }
 0x1c7   : > { %1130 = vrot.lane.b32.xlu0 %v1779_v31, %s2085_s29  ;;  %1608 = vmatpush3.bf16.msra.mxu0 %v812_v58  ;;  %v1783_v32 = vld [vmem:[#allocation4] ss:$0 sps:$4 sm:$0xff]  }
 0x1c8   : > { %1619 = vmatprep.subr.bf16.mxu0 %v2081_v0 }
 0x230   : > { %v1000_v38 = vpop.permute.xlu1 %999 }
 0x231   : > { %v869_v36 = vpop.permute.xlu0 %868  ;;  %v1005_v40 = vsel %vm748_vm3, %v1000_v38, 0 }
 0x232   : > { %v874_v37 = vsel %vm748_vm3, %v869_v36, 0 }
 0x233   : > { %1614 = vmatpush3.bf16.xpose.msra.mxu1 %v874_v37  ;;  %v1784_v37 = vld [vmem:[#allocation4] ss:$0 sps:$4 sm:$0xff]  }
 0x234   : > { %1625 = vmatprep.subr.bf16.mxu1 %v2081_v0  ;;  %v995_v42 = vpop.permute.xlu1 %994 }
 0x235   : > { %v864_v39 = vpop.permute.xlu0 %863 }
 0x238   : > { %v1126_v44 = vpop.permute.xlu1 %1125 }
 0x239   : > { %v1131_v41 = vpop.permute.xlu0 %1130 }
 0x23a   : > { %1616 = vmatmul.mubr.msk.bf16.vlgmr.msra.gmra.mrb[8].mxu1 %vm748_vm3, %v864_v39  ;;  %v1136_v43 = vsel %vm748_vm3, %v1131_v41, 0 }
 0x23b   : > { %1626 = vmatpush3.bf16.xpose.msra.mxu1 %v1005_v40  ;;  %1627 = vmatprep.mubr.msk.bf16.mxu1 %vm2082_vm0, %v2081_v0 }
 0x23c   : > { %1637 = vmatprep.subr.bf16.mxu1 %v2081_v0 }
 0x242   : > { %1628 = vmatmul.mubr.msk.bf16.vlgmr.msra.gmra.mrb[12].mxu1 %vm748_vm3, %v995_v42 }
 0x243   : > { %1638 = vmatpush3.bf16.xpose.msra.mxu1 %v1136_v43  ;;  %1639 = vmatprep.mubr.msk.bf16.mxu1 %vm2082_vm0, %v2081_v0 }
 0x244   : > { %1649 = vmatprep.subr.bf16.mxu1 %v2081_v0 }
 0x24a   : > { %1640 = vmatmul.mubr.msk.bf16.vlgmr.msra.gmra.mrb[16].mxu1 %vm748_vm3, %v1126_v44 }
 0x24b   : > { %1653 = vmatprep.mubr.msk.bf16.mxu1 %vm2082_vm0, %v2081_v0 }
 0x298   : > { %v789_v45 = vpop.f32.mrb[4].mxu1 }
 0x299   : > { %v1605_v46 = vpop.f32.mrb[5].mxu1  ;;  %v795_v47 = vsel %vm748_vm3, %v789_v45, -inf }
 0x29a   : > { %796 = vmax.xlane.f32.xlu0 %v795_v47  ;;  %v792_v48 = vpop.f32.mrb[6].mxu1 }
 0x29b   : > { %v1606_v49 = vpop.f32.mrb[7].mxu1 }
 0x30d   : > { %v910_v59 = vpop.f32.mrb[8].mxu1 }
 0x30e   : > { %v1617_v60 = vpop.f32.mrb[9].mxu1  ;;  %v916_v61 = vsel %vm748_vm3, %v910_v59, -inf }
 0x30f   : > { %917 = vmax.xlane.f32.xlu1 %v916_v61  ;;  %v913_v62 = vpop.f32.mrb[10].mxu1 }
 0x310   : > { %v1618_v63 = vpop.f32.mrb[11].mxu1 }
 0x315   : > { %v1041_v1 = vpop.f32.mrb[12].mxu1 }
 0x316   : > { %v1629_v2 = vpop.f32.mrb[13].mxu1  ;;  %v1047_v3 = vsel %vm748_vm3, %v1041_v1, -inf }
 0x317   : > { %1048 = vmax.xlane.f32.xlu0 %v1047_v3  ;;  %v1044_v4 = vpop.f32.mrb[14].mxu1  ;;  %v1785_v3 = vld [vmem:[%s2670_s21] sm:$0xff]  }
 0x318   : > { %v1630_v5 = vpop.f32.mrb[15].mxu1  ;;  %1650 = vmatpush3.bf16.msra.mxu1 %v1785_v3 }
 0x319   : > { %v1786_v5 = vld [vmem:[%s2671_s4 + $0x8] sm:$0xff]   ;;  %1651 = vmatprep.subr.bf16.mxu1 %v2081_v0 }
 0x31c   : > { %1652 = vmatpush3.bf16.msra.mxu1 %v1786_v5 }
 0x31d   : > { %v1172_v6 = vpop.f32.mrb[16].mxu1 }
 0x31e   : > { %v1641_v7 = vpop.f32.mrb[17].mxu1  ;;  %v1178_v8 = vsel %vm748_vm3, %v1172_v6, -inf }
 0x31f   : > { %1179 = vmax.xlane.f32.xlu0 %v1178_v8  ;;  %v1175_v9 = vpop.f32.mrb[18].mxu1 }
 0x320   : > { %v1642_v10 = vpop.f32.mrb[19].mxu1 }
 0x327   : > { %v797_v11 = vpop.xlane.xlu0 %796 }
 0x328   : > { %v798_v12 = vsub.f32 %v789_v45, %v797_v11 }
 0x32a   : > { %v799_v13 = vmul.f32 1.442695, %v798_v12 }
 0x32c   : > { %1787 = vpow2.f32 %v799_v13 }
 0x336   : > { %v1788_v14 = vpop.eup %1787 }
 0x337   : > { %v801_v15 = vsel %vm748_vm3, %v1788_v14, 0.0 }
 0x338   : > { %802 = vadd.xlane.f32.xlu1 %v801_v15 }
 0x349   : > { %931 = vrot.lane.b32.xlu1 %v1782_v16, %s2084_s22 }
 0x39c   : > { %v918_v17 = vpop.xlane.xlu1 %917 }
 0x39d   : > { %v919_v18 = vsub.f32 %v910_v59, %v918_v17 }
 0x39f   : > { %v920_v19 = vmul.f32 1.442695, %v919_v18  ;;  %v1538_v18 = vld [vmem:[%s2673_s30] ss:$0 sm:$0xff] }
 0x3a1   : > { %1789 = vpow2.f32 %v920_v19 }
 0x3a4   : > { %v1049_v20 = vpop.xlane.xlu0 %1048 }
 0x3a5   : > { %v1050_v21 = vsub.f32 %v1041_v1, %v1049_v20 }
 0x3a7   : > { %v1051_v22 = vmul.f32 1.442695, %v1050_v21 }
 0x3a9   : > { %1791 = vpow2.f32 %v1051_v22 }
 0x3ab   : > { %v1790_v23 = vpop.eup %1789 }
 0x3ac   : > { %v1180_v24 = vpop.xlane.xlu0 %1179  ;;  %v922_v25 = vsel %vm748_vm3, %v1790_v23, 0.0 }
 0x3ad   : > { %v1181_v26 = vsub.f32 %v1172_v6, %v1180_v24  ;;  %923 = vadd.xlane.f32.xlu0 %v922_v25 }
 0x3af   : > { %v1182_v27 = vmul.f32 1.442695, %v1181_v26 }
 0x3b1   : > { %1793 = vpow2.f32 %v1182_v27 }
 0x3b3   : > { %v1792_v28 = vpop.eup %1791 }
 0x3b4   : > { %v1053_v29 = vsel %vm748_vm3, %v1792_v28, 0.0 }
 0x3b5   : > { %1054 = vadd.xlane.f32.xlu1 %v1053_v29 }
 0x3bb   : > { %v1794_v30 = vpop.eup %1793 }
 0x3bc   : > { %v1184_v31 = vsel %vm748_vm3, %v1794_v30, 0.0 }
 0x3bd   : > { %1185 = vadd.xlane.f32.xlu0 %v1184_v31 }
 0x3c5   : > { %v803_v33 = vpop.xlane.xlu1 %802 }
 0x3c6   : > { %1795 = vrcp.f32 %v803_v33  ;;  %1193 = vrot.lane.b32.xlu1 %v1783_v32, %s2085_s29  ;;  %s1319_s29 = scalar_lea.sflag [#allocation8], %s2407_s3 }
 0x3c9   : > { %v932_v35 = vpop.permute.xlu1 %931 }
 0x3ca   : > { %v937_v39 = vsel %vm810_vm4, %v932_v35, 0 }
 0x3d0   : > { %v1796_v34 = vpop.eup %1795 }
 0x3d1   : > { %v805_v36 = vmul.f32 %v1796_v34, %v1788_v14 }
 0x3d3   : > { %1062 = vrot.lane.b32.xlu0 %v1784_v37, %s2083_s10  ;;  %v806_v38 = vpack.c.bf16 %v805_v36, %v805_v36  ;;  %s2675_s10 = sld [smem:[#allocation37_spill]] }
 0x3d5   : > { %1610 = vmatmul.mubr.msk.bf16.vlgmr.msra.gmra.mrb[8].mxu0 %vm748_vm3, %v806_v38 }
 0x3d6   : > { %1620 = vmatpush3.bf16.msra.mxu0 %v937_v39  ;;  %1621 = vmatprep.mubr.msk.bf16.mxu0 %vm2082_vm0, %v2081_v0 }
 0x3d7   : > { %1631 = vmatprep.subr.bf16.mxu0 %v2081_v0 }
 0x3d9   : > { %s2541_s22 = scalar_lea.hbm %s2675_s10, %s1543_s16 }
 0x43a   : > { %v924_v40 = vpop.xlane.xlu0 %923 }
 0x43b   : > { %1797 = vrcp.f32 %v924_v40 }
 0x442   : > { %v1055_v41 = vpop.xlane.xlu1 %1054 }
 0x443   : > { %1799 = vrcp.f32 %v1055_v41 }
 0x445   : > { %v1798_v42 = vpop.eup %1797 }
 0x446   : > { %v926_v43 = vmul.f32 %v1798_v42, %v1790_v23  ;;  %v1194_v50 = vpop.permute.xlu1 %1193 }
 0x447   : > { %v1199_v52 = vsel %vm810_vm4, %v1194_v50, 0 }
 0x448   : > { %v927_v44 = vpack.c.bf16 %v926_v43, %v926_v43 }
 0x44a   : > { %v1186_v45 = vpop.xlane.xlu0 %1185  ;;  %1622 = vmatmul.mubr.msk.bf16.vlgmr.msra.gmra.mrb[12].mxu0 %vm748_vm3, %v927_v44 }
 0x44b   : > { %1801 = vrcp.f32 %v1186_v45  ;;  %1633 = vmatprep.mubr.msk.bf16.mxu0 %vm2082_vm0, %v2081_v0 }
 0x44d   : > { %v1800_v46 = vpop.eup %1799 }
 0x44e   : > { %v1057_v47 = vmul.f32 %v1800_v46, %v1792_v28  ;;  %v1063_v48 = vpop.permute.xlu0 %1062 }
 0x44f   : > { %v1068_v49 = vsel %vm810_vm4, %v1063_v48, 0 }
 0x450   : > { %1632 = vmatpush3.bf16.msra.mxu0 %v1068_v49  ;;  %v1058_v51 = vpack.c.bf16 %v1057_v47, %v1057_v47 }
 0x451   : > { %1643 = vmatprep.subr.bf16.mxu0 %v2081_v0 }
 0x453   : > { %1634 = vmatmul.mubr.msk.bf16.vlgmr.msra.gmra.mrb[16].mxu0 %vm748_vm3, %v1058_v51 }
 0x454   : > { %1644 = vmatpush3.bf16.msra.mxu0 %v1199_v52  ;;  %1645 = vmatprep.mubr.msk.bf16.mxu0 %vm2082_vm0, %v2081_v0 }
 0x455   : > { %v1802_v53 = vpop.eup %1801 }
 0x456   : > { %v1188_v54 = vmul.f32 %v1802_v53, %v1794_v30 }
 0x458   : > { %v1189_v55 = vpack.c.bf16 %v1188_v54, %v1188_v54 }
 0x45b   : > { %1646 = vmatmul.mubr.msk.bf16.vlgmr.msra.gmra.mrb[20].mxu0 %vm748_vm3, %v1189_v55 }
 0x4a8   : > { %v848_v56 = vpop.f32.mrb[8].mxu0 }
 0x4a9   : > { %v854_v57 = vpack.c.bf16 %v848_v56, %v848_v56  ;;  %v1611_v58 = vpop.f32.mrb[9].mxu0 }
 0x4aa   : > { %v851_v59 = vpop.f32.mrb[10].mxu0 }
 0x4ab   : > { %856 = vst.msk [vmem:[#allocation5] sm:$0xf] %vm855_vm5, %v854_v57  ;;  %v1612_v60 = vpop.f32.mrb[11].mxu0 }
 0x51d   : > { %v973_v61 = vpop.f32.mrb[12].mxu0 }
 0x51e   : > { %v1546_v62 = vpack.c.bf16 %v973_v61, %v973_v61  ;;  %v1623_v63 = vpop.f32.mrb[13].mxu0 }
 0x51f   : > { %v976_v1 = vpop.f32.mrb[14].mxu0 }
 0x520   : > { %983 = vrot.lane.b32.xlu1 %v1546_v62, %s2086_s26  ;;  %v1624_v2 = vpop.f32.mrb[15].mxu0  ;;  %s2089_s26 = smov [#allocation17]  }
 0x521   : > { %s1981_s15 = sshll.u32 %s2089_s26, 4  ;;  %s1982_s15 = int_to_ptr.vmem [resolvable:$false] %s1981_s15 }
 0x522   : > { %s1983_s1 = scalar_lea.vmem %s1982_s15, 256  ;;  %p1984_p13 = scmp.lt.s32.totalorder %s2543_s11, %s1982_s15 }
 0x523   : > { %p1985_p6 = scmp.lt.s32.totalorder %s1983_s1, %s1977_s9 }
 0x525   : > { %p1986_p0 = por %p1985_p6, %p1984_p13 }
 0x526   : > { %v1104_v4 = vpop.f32.mrb[16].mxu0 }
 0x527   : > { %v1547_v6 = vpack.c.bf16 %v1104_v4, %v1104_v4  ;;  %v1635_v7 = vpop.f32.mrb[17].mxu0  ;;  %p1987_p12 = pnand %p1986_p0, %p1980_p1 }
 0x528   : > { %v1107_v8 = vpop.f32.mrb[18].mxu0 }
 0x529   : > { %1114 = vrot.lane.b32.xlu0 %v1547_v6, %s2087_s24  ;;  %v1636_v9 = vpop.f32.mrb[19].mxu0 }
 0x52e   : > { %v1235_v10 = vpop.f32.mrb[20].mxu0 }
 0x52f   : > { %v1548_v11 = vpack.c.bf16 %v1235_v10, %v1235_v10  ;;  %v1647_v12 = vpop.f32.mrb[21].mxu0 }
 0x530   : > { %v1238_v13 = vpop.f32.mrb[22].mxu0 }
 0x531   : > { %1245 = vrot.lane.b32.xlu1 %v1548_v11, %s2088_s25  ;;  %v1648_v14 = vpop.f32.mrb[23].mxu0 }
 0x592   : > { %v984_v15 = vpop.permute.xlu1 %983 }
 0x593   : > { %987 = vst.msk [vmem:[#allocation5] sm:$0xf] %vm986_vm6, %v984_v15 }
 0x59b   : > { %v1115_v16 = vpop.permute.xlu0 %1114 }
 0x59c   : > { %1118 = vst.msk [vmem:[#allocation5] sm:$0xf] %vm1117_vm7, %v1115_v16 }
 0x5a3   : > { %v1246_v0 = vpop.permute.xlu1 %1245 }
 0x5a4   : > { %1249 = vst.msk [vmem:[#allocation5] sm:$0xf] %vm1248_vm8, %v1246_v0 }
 0x5ab   : > { %v1250_v17 = vld [vmem:[#allocation5] sm:$0xf] }
 0x5ac   : > { %1654 = vmatmul.mubr.msk.bf16.vlgmr.msra.gmra.mrb[20].mxu1 %vm558_vm1, %v1250_v17 }
 0x67f   : > { %v1311_v19 = vpop.f32.mrb[20].mxu1 }
 0x680   : > { %v1312_v20 = vadd.f32 %v1538_v18, %v1311_v19  ;;  %v1655_v21 = vpop.f32.mrb[21].mxu1 }
 0x681   : > { %v1314_v22 = vpop.f32.mrb[22].mxu1 }
 0x682   : > { %v1656_v23 = vpop.f32.mrb[23].mxu1  ;;  %1317 = vst.msk [vmem:[%s531_s17] sm:$0xff] %vm558_vm1, %v1312_v20 }
 0x683   : > { %1990 = shalt.err (!%p1987_p12)
}
 0x684   : > { %s1991_s3 = scalar_lea.hbm %s2541_s22, 128  ;;  %s1995_s14 = scalar_lea.hbm %s2675_s10, 256 }
 0x685   : > { %p1992_p8 = scmp.ne.s32.totalorder %s2541_s22, %s1991_s3  ;;  %p1996_p5 = scmp.lt.u32.totalorder %s2541_s22, %s2675_s10 }
 0x686   : > { %p1997_p9 = scmp.lt.u32.totalorder %s1995_s14, %s1991_s3  ;;  %p1999_p4 = scmp.lt.u32.totalorder %s1991_s3, %s2541_s22 }
 0x687   : > { %p1993_p11 = pnand %p1992_p8, %p2676_p7 }
 0x688   : > { %p1998_p2 = por %p1997_p9, %p1996_p5 }
 0x689   : > { %p1994_p10 = pneg %p1993_p11 }
 0x68a   : > { %p2000_p3 = por %p1999_p4, %p1998_p2 }
 0x68c   : > { %p2001_p1 = pnand %p2000_p3, %p1994_p10 }
 0x68e   : > { %2004 = shalt.err (!%p2001_p1)
}
 0x68f   : > { %1675 = dma.vmem_to_hbm [thread:$0]  (%p2676_p7), %s2543_s11, 128, %s2541_s22, %s1319_s29  }
 0x690 PF: > { %s2677_s25 = sld [smem:[#allocation23_spill]]  ;;  %s2678_s13 = sld [smem:[#allocation27_spill]] }
 0x691   : > { %s2679_s23 = sld [smem:[#allocation26_spill]] }
 0x696   : > { %s1345_s30 = sand.u32 1, %s2677_s25   ;;  %p2680_p13 = scmp.ne.s32.totalorder %s2678_s13, 0 }
 0x697   : > { %p2681_p6 = scmp.ge.s32.totalorder %s2679_s23, 2  ;;  %s1346_s16 = scalar_lea.sflag [#allocation8], %s1345_s30 }
 0x699   : > { %p1698_p0 = pnand %p2681_p6, %p2680_p13 }
 0x69b   : > { %2046 = dma.done.wait (!%p1698_p0), %s1346_s16, 128  }
 0x69c   : > { %2048 = vsyncadd (!%p1698_p0), %s1346_s16, 4294967168  ;;  %s32_s22 = sadd.s32 1, %s2679_s23   ;;  %s2682_s12 = sld [smem:[#allocation30_spill]] }
 0x69d   : > { %p29_p12 = scmp.ge.s32.totalorder %s32_s22, 4   ;;  %s2683_s20 = sld [smem:[#allocation25_spill]] }
 0x69e   : > { %s2684_s21 = sld [smem:[#allocation28_spill]]  ;;  %s2685_s17 = smov %s2055_s18 }
 0x69f   : > { %s2686_s18 = smov %s2059_s19  ;;  %31 = sbr.rel (!%p29_p12) target bundleno = 18 (0x12), region = 145 }
 0x6a2   : > { %s2687_s19 = smov %s2682_s12 }
 0x6a6   :  { %1351 = vsyncpa [#allocation7], 1 }
 0x6a7   :  { %1353 = vsyncpa [#allocation7 + $0x1], 1 }
 0x6a8   :  { %1354 = vsyncpa [#allocation10], 1 }
 0x6a9   :  { %1356 = vsyncpa [#allocation10 + $0x1], 1 }
 0x6aa   :  { %1357 = vsyncpa [#allocation13], 1 }
 0x6ab   :  { %1358 = vsyncpa [#allocation16], 1 }
 0x6ac   :  { %1359 = vsyncpa [#allocation8], 1 }
 0x6ad   :  { %1361 = vsyncpa [#allocation8 + $0x1], 1 }

</bundles_post_ra>
